<compile_context>
chip_gen: v7x
topology: tpu7x:2x2x1
jax: 0.10.0
libtpu: 0.0.40
codegen_flags: <defaults>
</compile_context>

<pallas_src>
import jax
import jax.numpy as jnp
from jax.experimental import pallas as pl
from jax.experimental.pallas import tpu as pltpu


def _embedding_kernel(x_ref, nsum_ref, amat_ref, seg_ref, expnum_ref, o_ref):
    """One grid step over TB consecutive batch elements, flat lane-dense layout.

    x_ref      : (TB, N*D)  streamed input slab, x_flat[t, n*D+j] = x[t, n, j]
    nsum_ref   : (N*D, D)   nsum[n*D+j, j'] = (j == j')                (resident)
    amat_ref   : (D, C*D)   amat[j, i*D+j'] = a[i] * (j == j')         (resident)
    seg_ref    : (C*D, C)   seg[i*D+j, i'] = (i == i')                 (resident)
    expnum_ref : (C, C*D)   expnum[i', i*D+j] = (i==i') * exp(a[i]b[j])(resident)
    o_ref      : (TB, C*D)  flat output slab
    """
    # s[t, j] = sum_n x[t, n, j]  -- lane-dense one-hot matmul on the MXU.
    s = jnp.dot(x_ref[...], nsum_ref[...],
                preferred_element_type=jnp.float32)                     # (TB, D)

    # arg[t, i*D+j] = a[i] * s[t, j], built lane-dense via a one-hot matmul.
    arg = jnp.dot(s, amat_ref[...],
                  preferred_element_type=jnp.float32)                   # (TB, C*D)

    # Only per-element transcendental.  seg's dtype doubles as the exp compute
    # dtype: bf16 on v6e/v7x (bf16 EUP), f32 on v5e (no bf16 EUP path there).
    seg = seg_ref[...]
    e = jnp.exp(arg.astype(seg.dtype))                                  # (TB, C*D)

    # den[t, i] = sum_j exp(a[i] * s[t, j])  -- segmented lane sum via MXU,
    # accumulated in f32.
    den = jnp.dot(e, seg, preferred_element_type=jnp.float32)           # (TB, C)

    # Exact reciprocal: only TB*C values, essentially free on the EUP.
    inv = pl.reciprocal(den, approx=False)                              # (TB, C)

    # out[t, i*D+j] = exp(a[i]*b[j]) * inv[t, i]  -- numf is folded into the
    # expand matrix, so this single MXU matmul writes the output directly.
    o_ref[...] = jnp.dot(inv, expnum_ref[...],
                         preferred_element_type=jnp.float32).astype(o_ref.dtype)


def _device_defaults():
    """Per-generation defaults: (scoped-VMEM budget, exp dtype, x stream dtype)."""
    try:
        kind = jax.devices()[0].device_kind.lower()
    except Exception:  # pragma: no cover - conservative fallback
        kind = ""
    is_v6_plus = ("v6" in kind) or ("v7" in kind) or ("7x" in kind)
    is_v5 = "v5" in kind
    # Default scoped-VMEM limits: ~16 MiB on v5e, ~32 MiB on v6e/v7x.
    # Keep 25% headroom for compiler-internal scratch.
    budget = int(0.75 * ((32 << 20) if is_v6_plus else (16 << 20)))
    # bf16 exp only where the EUP has a bf16 path (v6e/v7x); v5e stays f32.
    exp_dtype = jnp.bfloat16 if is_v6_plus else jnp.float32
    # v5e is HBM-bound (~820 GB/s): halve the streamed x bytes there.
    x_dtype = jnp.bfloat16 if is_v5 else jnp.float32
    return budget, exp_dtype, x_dtype


def _pad_tile_bytes(rows, cols, itemsize):
    """VMEM footprint of a (rows, cols) buffer after (8, 128) tile padding."""
    return pl.cdiv(rows, 8) * 8 * pl.cdiv(cols, 128) * 128 * itemsize


def _pick_t_block(T, N, C, D, *, x_bytes, exp_bytes, out_bytes, vmem_budget,
                  resident_bytes):
    """Pick the t batch per grid step against a real VMEM budget.

    Counts the double-buffered x and out pipeline slabs plus the main in-body
    intermediates (s, arg, e) per row, on top of the resident one-hot helpers.
    Caps TB so the grid keeps >= ~4 steps (DMA/compute overlap, and room for
    megacore sharding of the "parallel" axis across v7x's 2 TensorCores).
    """
    pad = lambda n: pl.cdiv(n, 128) * 128
    row_bytes = (2 * pad(N * D) * x_bytes          # x slab (double-buffered)
                 + 2 * pad(C * D) * out_bytes      # out slab (double-buffered)
                 + pad(C * D) * (4 + exp_bytes)    # arg (f32) + e intermediates
                 + pad(D) * 4)                     # s intermediate
    avail = max(0, vmem_budget - resident_bytes)
    tb = max(1, avail // row_bytes)
    tb = min(tb, T)
    if T >= 16:
        # Keep >= ~4 grid steps (never fewer than 2) so the x DMA and the
        # output writeback overlap with compute instead of being exposed.
        tb = min(tb, max(8, pl.cdiv(T, 4)))
    if tb >= T:
        return T
    # Sub-T tiles must keep the sublane dim a multiple of 8.
    return max(8, (tb // 8) * 8)


def embedding_forward(x, weight, *, t_block=None, out_dtype=jnp.float32):
    """x: (T, N, D), weight: (C, D) -> (T, C, D) float output with
    out[t, i, j] = exp(a_i * b_j) / sum_j' exp(a_i * s_tj')."""
    T, N, D = x.shape
    C, Dw = weight.shape
    assert Dw == D, "x.shape[-1] must equal `dimension`"

    vmem_budget, exp_dtype, x_dtype = _device_defaults()
    weight = weight.astype(jnp.float32)

    # ---- t-invariant precompute, hoisted out of the grid loop (plain JAX) ----
    a = jnp.sum(weight, axis=1)                                  # (C,) row sums
    b = jnp.sum(weight, axis=0)                                  # (D,) col sums
    # TODO(synk): raw exp matches the PyTorch module but overflows once
    # |a_i*b_j| or |a_i*s_tj| exceeds ~88 in f32; a stabilized variant would
    # need a per-(t, i) max subtraction (making the numerator t-dependent).
    numf = jnp.exp(a[:, None] * b[None, :]).reshape(1, C * D)    # (1, C*D)

    eye_c = jnp.eye(C, dtype=jnp.float32)
    eye_d = jnp.eye(D, dtype=jnp.float32)
    # nsum[n*D+j, j'] = (j == j')        : n-sum of the flat x slab
    nsum = jnp.tile(eye_d, (N, 1)).astype(x_dtype)               # (N*D, D)
    # amat[j, i*D+j'] = a[i]*(j == j')   : lane-dense a[i]*s[t,j] expansion
    amat = jnp.tile(eye_d, (1, C)) * jnp.repeat(a, D)[None, :]   # (D, C*D)
    # seg[i*D+j, i'] = (i == i')         : per-channel denominator sum
    seg = jnp.repeat(eye_c, D, axis=0).astype(exp_dtype)         # (C*D, C)
    # expnum[i', i*D+j] = (i==i') * exp(a[i]*b[j]) : numf folded into expand
    expnum = jnp.repeat(eye_c, D, axis=1) * numf                 # (C, C*D)

    # x streamed lane-dense as (T, N*D) (free row-major reshape); bf16 on v5e
    # halves the dominant HBM read stream.  All matmuls accumulate in f32.
    x_flat = x.astype(x_dtype).reshape(T, N * D)

    x_bytes = jnp.dtype(x_dtype).itemsize
    exp_bytes = jnp.dtype(exp_dtype).itemsize
    out_bytes = jnp.dtype(out_dtype).itemsize
    # Resident one-hot helpers (default double-buffered by Pallas -> 2x).
    resident_bytes = 2 * (
        _pad_tile_bytes(N * D, D, x_bytes)
        + _pad_tile_bytes(D, C * D, 4)
        + _pad_tile_bytes(C * D, C, exp_bytes)
        + _pad_tile_bytes(C, C * D, 4))

    if t_block is not None:
        TB = min(int(t_block), T)
        if TB < T:
            TB = max(8, (TB // 8) * 8)
    else:
        TB = _pick_t_block(T, N, C, D, x_bytes=x_bytes, exp_bytes=exp_bytes,
                           out_bytes=out_bytes, vmem_budget=vmem_budget,
                           resident_bytes=resident_bytes)
    grid = (pl.cdiv(T, TB),)

    out_flat = pl.pallas_call(
        _embedding_kernel,
        out_shape=jax.ShapeDtypeStruct((T, C * D), out_dtype),
        grid_spec=pltpu.PrefetchScalarGridSpec(
            num_scalar_prefetch=0,
            grid=grid,
            in_specs=[
                pl.BlockSpec((TB, N * D), lambda t: (t, 0)),   # x (streamed)
                pl.BlockSpec((N * D, D), lambda t: (0, 0)),    # nsum (resident)
                pl.BlockSpec((D, C * D), lambda t: (0, 0)),    # amat (resident)
                pl.BlockSpec((C * D, C), lambda t: (0, 0)),    # seg (resident)
                pl.BlockSpec((C, C * D), lambda t: (0, 0)),    # expnum (resident)
            ],
            out_specs=pl.BlockSpec((TB, C * D), lambda t: (t, 0)),
        ),
        compiler_params=pltpu.CompilerParams(
            # Rows are independent; a partial last block (T % TB != 0) just
            # computes on padded rows whose writeback Pallas clips -- fine.
            dimension_semantics=("parallel",),
        ),
    )(x_flat, nsum, amat, seg, expnum)

    # Free row-major reshape back to the module's (T, C, D) layout.
    return out_flat.reshape(T, C, D)


def _reference(x, weight):
    """Pure-JAX reference matching the simplified torch semantics."""
    a = jnp.sum(weight, axis=1)                                     # (C,)
    b = jnp.sum(weight, axis=0)                                     # (D,)
    s = jnp.sum(x, axis=1)                                          # (T, D)
    num = jnp.exp(a[None, :, None] * b[None, None, :])              # (1, C, D)
    den = jnp.sum(jnp.exp(a[None, :, None] * s[:, None, :]), -1)    # (T, C)
    return num / den[..., None]


if __name__ == "__main__":
    # Small shapes consistent with the module's forward:
    #   dimension=32, channels=8, inner rows N=8, batch T.
    dimension, channels, N = 32, 8, 8

    fwd = jax.jit(embedding_forward)
    key = jax.random.PRNGKey(0)

    # T=2  : tiny single-step grid (TB == T).
    # T=37 : multi-step grid with a partial last block (Pallas write-clipping).
    for T in (2, 37):
        key, kx, kw = jax.random.split(key, 3)
        # Small scale keeps the module's raw exp() in a sane range.
        x = 0.05 * jax.random.normal(kx, (T, N, dimension), dtype=jnp.float32)
        weight = 0.05 * jax.random.normal(kw, (channels, dimension),
                                          dtype=jnp.float32)

        out = jax.block_until_ready(fwd(x, weight))
        ref = _reference(x, weight)

        assert out.shape == (T, channels, dimension)
        # Tolerance covers the bf16 exp path (v6e/v7x) / bf16 x stream (v5e).
        assert jnp.allclose(out, ref, rtol=2e-2, atol=1e-4), (
            T, float(jnp.max(jnp.abs(out - ref))))

    print("KERNEL_OK")
</pallas_src>

<mosaic_0001>
module attributes {stable_mosaic.version = 11 : i64} {
  func.func @_embedding_kernel(%arg0: i32, %arg1: memref<2x256xf32, #tpu.memory_space<vmem>>, %arg2: memref<256x32xf32, #tpu.memory_space<vmem>>, %arg3: memref<32x256xf32, #tpu.memory_space<vmem>>, %arg4: memref<256x8xf32, #tpu.memory_space<vmem>>, %arg5: memref<8x256xf32, #tpu.memory_space<vmem>>, %arg6: memref<2x256xf32, #tpu.memory_space<vmem>>) attributes {dimension_semantics = [#tpu.dimension_semantics<parallel>], iteration_bounds = array<i64: 1>, scalar_prefetch = 0 : i64, scratch_operands = 0 : i64, tpu.core_type = #tpu.core_type<tc>, window_params = [{transform_indices = @transform_0, window_bounds = array<i64: 2, 256>}, {pipeline_mode = #tpu.pipeline_mode<synchronous>, transform_indices = @transform_1, window_bounds = array<i64: 256, 32>}, {pipeline_mode = #tpu.pipeline_mode<synchronous>, transform_indices = @transform_2, window_bounds = array<i64: 32, 256>}, {pipeline_mode = #tpu.pipeline_mode<synchronous>, transform_indices = @transform_3, window_bounds = array<i64: 256, 8>}, {pipeline_mode = #tpu.pipeline_mode<synchronous>, transform_indices = @transform_4, window_bounds = array<i64: 8, 256>}, {transform_indices = @transform_5, window_bounds = array<i64: 2, 256>}]} {
    %c0 = arith.constant 0 : index
    %c0_0 = arith.constant 0 : index
    %0 = vector.load %arg1[%c0, %c0_0] : memref<2x256xf32, #tpu.memory_space<vmem>>, vector<2x256xf32>
    %c0_1 = arith.constant 0 : index
    %c0_2 = arith.constant 0 : index
    %1 = vector.load %arg2[%c0_1, %c0_2] : memref<256x32xf32, #tpu.memory_space<vmem>>, vector<256x32xf32>
    %cst = arith.constant dense<0.000000e+00> : vector<2x32xf32>
    %2 = tpu.matmul %0, %1, %cst {dimension_numbers = #tpu.dot_dimension_numbers<[1], [0], [0], [1], [0, 0, 1, 1], [], []>} : vector<2x256xf32>, vector<256x32xf32>, vector<2x32xf32> -> vector<2x32xf32>
    %c0_3 = arith.constant 0 : index
    %c0_4 = arith.constant 0 : index
    %3 = vector.load %arg3[%c0_3, %c0_4] : memref<32x256xf32, #tpu.memory_space<vmem>>, vector<32x256xf32>
    %cst_5 = arith.constant dense<0.000000e+00> : vector<2x256xf32>
    %4 = tpu.matmul %2, %3, %cst_5 {dimension_numbers = #tpu.dot_dimension_numbers<[1], [0], [0], [1], [0, 0, 1, 1], [], []>} : vector<2x32xf32>, vector<32x256xf32>, vector<2x256xf32> -> vector<2x256xf32>
    %c0_6 = arith.constant 0 : index
    %c0_7 = arith.constant 0 : index
    %5 = vector.load %arg4[%c0_6, %c0_7] : memref<256x8xf32, #tpu.memory_space<vmem>>, vector<256x8xf32>
    %6 = math.exp %4 : vector<2x256xf32>
    %cst_8 = arith.constant dense<0.000000e+00> : vector<2x8xf32>
    %7 = tpu.matmul %6, %5, %cst_8 {dimension_numbers = #tpu.dot_dimension_numbers<[1], [0], [0], [1], [0, 0, 1, 1], [], []>} : vector<2x256xf32>, vector<256x8xf32>, vector<2x8xf32> -> vector<2x8xf32>
    %8 = tpu.reciprocal %7 : vector<2x8xf32> -> vector<2x8xf32>
    %c0_9 = arith.constant 0 : index
    %c0_10 = arith.constant 0 : index
    %9 = vector.load %arg5[%c0_9, %c0_10] : memref<8x256xf32, #tpu.memory_space<vmem>>, vector<8x256xf32>
    %cst_11 = arith.constant dense<0.000000e+00> : vector<2x256xf32>
    %10 = tpu.matmul %8, %9, %cst_11 {dimension_numbers = #tpu.dot_dimension_numbers<[1], [0], [0], [1], [0, 0, 1, 1], [], []>} : vector<2x8xf32>, vector<8x256xf32>, vector<2x256xf32> -> vector<2x256xf32>
    %c0_12 = arith.constant 0 : index
    %c0_13 = arith.constant 0 : index
    %11 = vector.load %arg6[%c0_12, %c0_13] : memref<2x256xf32, #tpu.memory_space<vmem>>, vector<2x256xf32>
    tpu.vector_store %arg6[%c0_12, %c0_13], %10 {strides = array<i32>} : memref<2x256xf32, #tpu.memory_space<vmem>>, vector<2x256xf32>,
    return
  }
  func.func @transform_0(%arg0: i32) -> (i32, i32) {
    %c0_i32 = arith.constant 0 : i32
    %c0_i32_0 = arith.constant 0 : i32
    return %arg0, %c0_i32 : i32, i32
  }
  func.func @transform_1(%arg0: i32) -> (i32, i32) {
    %c0_i32 = arith.constant 0 : i32
    %c0_i32_0 = arith.constant 0 : i32
    %c0_i32_1 = arith.constant 0 : i32
    return %c0_i32, %c0_i32_0 : i32, i32
  }
  func.func @transform_2(%arg0: i32) -> (i32, i32) {
    %c0_i32 = arith.constant 0 : i32
    %c0_i32_0 = arith.constant 0 : i32
    %c0_i32_1 = arith.constant 0 : i32
    return %c0_i32, %c0_i32_0 : i32, i32
  }
  func.func @transform_3(%arg0: i32) -> (i32, i32) {
    %c0_i32 = arith.constant 0 : i32
    %c0_i32_0 = arith.constant 0 : i32
    %c0_i32_1 = arith.constant 0 : i32
    return %c0_i32, %c0_i32_0 : i32, i32
  }
  func.func @transform_4(%arg0: i32) -> (i32, i32) {
    %c0_i32 = arith.constant 0 : i32
    %c0_i32_0 = arith.constant 0 : i32
    %c0_i32_1 = arith.constant 0 : i32
    return %c0_i32, %c0_i32_0 : i32, i32
  }
  func.func @transform_5(%arg0: i32) -> (i32, i32) {
    %c0_i32 = arith.constant 0 : i32
    %c0_i32_0 = arith.constant 0 : i32
    return %arg0, %c0_i32 : i32, i32
  }
}

</mosaic_0001>

<bundles_post_ra>
// kernel: mul.23
= control target key start
LH: loop header
LB: loop body
LE: loop exit
PB: predicated region body
PF: predicated region fallthrough
CT: control target
= control target key end

     0   :  { %s7_s6 = smov 3  ;;  %s14_s9 = smov 3  ;;  %vm4_vm0 = vcmask 261120   ;;  %vm11_vm1 = vcmask 1048320   ;;  %vm18_vm2 = vcmask 785920   ;;  %vm25_vm3 = vcmask 523520   ;;  %s67_s0 = inlined_call_operand.vmem [shape: f32[8,32], index: 0, kind: input, shape index: {}]   ;;  %s68_s1 = inlined_call_operand.vmem [shape: f32[256], index: 1, kind: output, shape index: {}]  }
   0x1   :  { %v33_v0 = vld [vmem:[%s67_s0 + $0x3] ss:$4 sm:%s7_s6]   ;;  %s39_s10 = smov 96   ;;  %s21_s11 = smov 3  ;;  %v34_v1 = vld [vmem:[%s67_s0 + $0x2] ss:$4 sm:%s14_s9]  }
   0x2   :  { %9 = vrot.lane.b32.xlu0 %v33_v0, %s39_s10  ;;  %v35_v2 = vld [vmem:[%s67_s0 + $0x1] ss:$4 sm:%s21_s11]   ;;  %s2_s16 = smov 3  ;;  %s40_s17 = smov 32  }
   0x3   :  { %23 = vrot.lane.b32.xlu1 %v35_v2, %s40_s17  ;;  %v3_v3 = vld [vmem:[%s67_s0] ss:$4 sm:%s2_s16]   ;;  %s41_s0 = smov 64  }
   0x4   :  { %5 = vst.msk [vmem:[#allocation0] sm:$0x3] %vm4_vm0, %v3_v3  }
   0x6   :  { %16 = vrot.lane.b32.xlu0 %v34_v1, %s41_s0 }
  0x74   :  { %v10_v4 = vpop.permute.xlu0 %9  }
  0x75   :  { %12 = vst.msk [vmem:[#allocation0] sm:$0x3] %vm11_vm1, %v10_v4   ;;  %v24_v5 = vpop.permute.xlu1 %23  }
  0x78   :  { %v17_v6 = vpop.permute.xlu0 %16  }
  0x79   :  { %19 = vst.msk [vmem:[#allocation0] sm:$0x3] %vm18_vm2, %v17_v6  }
  0x7a   :  { %26 = vst.msk [vmem:[#allocation0] sm:$0x3] %vm25_vm3, %v24_v5  }
  0x81   :  { %v30_v7 = vld [vmem:[#allocation0] sm:$0x3] }
  0x82   :  { %32 = vst [vmem:[%s68_s1] sm:$0x3] %v30_v7 }

// kernel: tile.19
= control target key start
LH: loop header
LB: loop body
LE: loop exit
PB: predicated region body
PF: predicated region fallthrough
CT: control target
= control target key end

     0   :  { %vm92_vm0 = vcmask 1047556   ;;  %s459_s14 = smov 96   ;;  %s460_s26 = smov 64   ;;  %vm3_vm1 = vcmask 261120   ;;  %vm96_vm2 = vcmask 1048320   ;;  %vm183_vm3 = vcmask 785920   ;;  %s904_s0 = inlined_call_operand.vmem [shape: f32[32,8,32], index: 0, kind: input, shape index: {}]   ;;  %s905_s1 = inlined_call_operand.vmem [shape: f32[32,256], index: 1, kind: output, shape index: {}]  }
   0x1   :  { %v392_v0 = vld [vmem:[%s904_s0 + $0x7] ss:$8 sm:$0xf]   ;;  %v387_v3 = vld [vmem:[%s904_s0 + $0x3] ss:$8 sm:$0xf]  }
   0x2   :  { %v393_v1 = vld [vmem:[%s904_s0 + $0x7] ss:$8 sm:$0xf0]   ;;  %v388_v4 = vld [vmem:[%s904_s0 + $0x3] ss:$8 sm:$0xf0]  }
   0x3   :  { %v114_v2 = vsel %vm92_vm0, %v393_v1, %v392_v0  ;;  %v93_v5 = vsel %vm92_vm0, %v388_v4, %v387_v3  ;;  %v395_v6 = vld [vmem:[%s904_s0 + $0x87] ss:$8 sm:$0xf]   ;;  %v389_v9 = vld [vmem:[%s904_s0 + $0x83] ss:$8 sm:$0xf]  }
   0x4   :  { %115 = vrot.lane.b32.xlu1 %v114_v2, %s459_s14  ;;  %v396_v7 = vld [vmem:[%s904_s0 + $0x87] ss:$8 sm:$0xf0]   ;;  %94 = vrot.lane.b32.xlu0 %v93_v5, %s459_s14  ;;  %v390_v10 = vld [vmem:[%s904_s0 + $0x83] ss:$8 sm:$0xf0]  }
   0x5   :  { %v125_v8 = vsel %vm92_vm0, %v396_v7, %v395_v6  ;;  %v103_v11 = vsel %vm92_vm0, %v390_v10, %v389_v9  ;;  %v401_v12 = vld [vmem:[%s904_s0 + $0xc3] ss:$8 sm:$0xf]   ;;  %v407_v18 = vld [vmem:[%s904_s0 + $0xc7] ss:$8 sm:$0xf]  }
   0x6   :  { %v402_v13 = vld [vmem:[%s904_s0 + $0xc3] ss:$8 sm:$0xf0]   ;;  %v408_v19 = vld [vmem:[%s904_s0 + $0xc7] ss:$8 sm:$0xf0]  }
   0x7   :  { %v398_v14 = vld [vmem:[%s904_s0 + $0x43] ss:$8 sm:$0xf]   ;;  %v147_v16 = vsel %vm92_vm0, %v402_v13, %v401_v12  ;;  %v404_v20 = vld [vmem:[%s904_s0 + $0x47] ss:$8 sm:$0xf]   ;;  %v169_v22 = vsel %vm92_vm0, %v408_v19, %v407_v18 }
   0x8   :  { %v399_v15 = vld [vmem:[%s904_s0 + $0x43] ss:$8 sm:$0xf0]   ;;  %126 = vrot.lane.b32.xlu1 %v125_v8, %s459_s14  ;;  %104 = vrot.lane.b32.xlu0 %v103_v11, %s459_s14  ;;  %v405_v21 = vld [vmem:[%s904_s0 + $0x47] ss:$8 sm:$0xf0]  }
   0x9   :  { %v136_v17 = vsel %vm92_vm0, %v399_v15, %v398_v14  ;;  %v158_v23 = vsel %vm92_vm0, %v405_v21, %v404_v20  ;;  %v412_v24 = vld [vmem:[%s904_s0 + $0x82] ss:$8 sm:$0xf]   ;;  %v418_v30 = vld [vmem:[%s904_s0 + $0x86] ss:$8 sm:$0xf]  }
   0xa   :  { %v413_v25 = vld [vmem:[%s904_s0 + $0x82] ss:$8 sm:$0xf0]   ;;  %v419_v31 = vld [vmem:[%s904_s0 + $0x86] ss:$8 sm:$0xf0]  }
   0xb   :  { %v410_v26 = vld [vmem:[%s904_s0 + $0x2] ss:$8 sm:$0xf]   ;;  %v190_v28 = vsel %vm92_vm0, %v413_v25, %v412_v24  ;;  %v415_v32 = vld [vmem:[%s904_s0 + $0x6] ss:$8 sm:$0xf]   ;;  %v212_v34 = vsel %vm92_vm0, %v419_v31, %v418_v30 }
   0xc   :  { %148 = vrot.lane.b32.xlu1 %v147_v16, %s459_s14  ;;  %137 = vrot.lane.b32.xlu0 %v136_v17, %s459_s14  ;;  %v411_v27 = vld [vmem:[%s904_s0 + $0x2] ss:$8 sm:$0xf0]   ;;  %v416_v33 = vld [vmem:[%s904_s0 + $0x6] ss:$8 sm:$0xf0]  }
   0xd   :  { %v180_v29 = vsel %vm92_vm0, %v411_v27, %v410_v26  ;;  %v201_v35 = vsel %vm92_vm0, %v416_v33, %v415_v32  ;;  %v424_v36 = vld [vmem:[%s904_s0 + $0xc2] ss:$8 sm:$0xf]   ;;  %v430_v40 = vld [vmem:[%s904_s0 + $0xc6] ss:$8 sm:$0xf]  }
   0xe   :  { %v425_v37 = vld [vmem:[%s904_s0 + $0xc2] ss:$8 sm:$0xf0]   ;;  %v431_v42 = vld [vmem:[%s904_s0 + $0xc6] ss:$8 sm:$0xf0]  }
   0xf   :  { %v421_v38 = vld [vmem:[%s904_s0 + $0x42] ss:$8 sm:$0xf]   ;;  %v234_v41 = vsel %vm92_vm0, %v425_v37, %v424_v36  ;;  %v427_v43 = vld [vmem:[%s904_s0 + $0x46] ss:$8 sm:$0xf]   ;;  %v256_v53 = vsel %vm92_vm0, %v431_v42, %v430_v40 }
  0x10   :  { %170 = vrot.lane.b32.xlu1 %v169_v22, %s459_s14  ;;  %159 = vrot.lane.b32.xlu0 %v158_v23, %s459_s14  ;;  %v422_v39 = vld [vmem:[%s904_s0 + $0x42] ss:$8 sm:$0xf0]   ;;  %v428_v45 = vld [vmem:[%s904_s0 + $0x46] ss:$8 sm:$0xf0]  }
  0x11   :  { %v223_v44 = vsel %vm92_vm0, %v422_v39, %v421_v38  ;;  %v367_v46 = vld [vmem:[%s904_s0 + $0x80] ss:$4 sm:$0xff]   ;;  %v245_v55 = vsel %vm92_vm0, %v428_v45, %v427_v43  ;;  %v435_v56 = vld [vmem:[%s904_s0 + $0x81] ss:$8 sm:$0xf]   ;;  %s461_s25 = smov 32  }
  0x12   :  { %368 = vst.msk [vmem:[%s905_s1 + $0x20] ss:$8 sm:$0x3] %vm3_vm1, %v367_v46   ;;  %369 = vst.msk [vmem:[%s905_s1 + $0x11] ss:$8 sm:$0xc] %vm3_vm1, %v367_v46  }
  0x13   :  { %370 = vst.msk [vmem:[%s905_s1 + $0x2] ss:$8 sm:$0x30] %vm3_vm1, %v367_v46   ;;  %371 = vst.msk [vmem:[%s905_s1 - $0xd] ss:$8 sm:$0xc0] %vm3_vm1, %v367_v46  }
  0x14   :  { %191 = vrot.lane.b32.xlu1 %v190_v28, %s460_s26  ;;  %181 = vrot.lane.b32.xlu0 %v180_v29, %s460_s26  ;;  %v372_v47 = vld [vmem:[%s904_s0 + $0xa0] ss:$4 sm:$0xff]   ;;  %v436_v57 = vld [vmem:[%s904_s0 + $0x81] ss:$8 sm:$0xf0]   ;;  %vm270_vm4 = vcmask 523520  }
  0x15   :  { %v2_v48 = vld [vmem:[%s904_s0] ss:$4 sm:$0xff]   ;;  %373 = vst.msk [vmem:[%s905_s1 + $0x24] ss:$8 sm:$0x3] %vm3_vm1, %v372_v47   ;;  %v277_v60 = vsel %vm92_vm0, %v436_v57, %v435_v56 }
  0x16   :  { %v352_v49 = vld [vmem:[%s904_s0 + $0x20] ss:$4 sm:$0xff]   ;;  %374 = vst.msk [vmem:[%s905_s1 + $0x15] ss:$8 sm:$0xc] %vm3_vm1, %v372_v47  }
  0x17   :  { %375 = vst.msk [vmem:[%s905_s1 + $0x6] ss:$8 sm:$0x30] %vm3_vm1, %v372_v47   ;;  %376 = vst.msk [vmem:[%s905_s1 - $0x9] ss:$8 sm:$0xc0] %vm3_vm1, %v372_v47  }
  0x18   :  { %213 = vrot.lane.b32.xlu1 %v212_v34, %s460_s26  ;;  %202 = vrot.lane.b32.xlu0 %v201_v35, %s460_s26  ;;  %4 = vst.msk [vmem:[%s905_s1] ss:$8 sm:$0x3] %vm3_vm1, %v2_v48   ;;  %349 = vst.msk [vmem:[%s905_s1 - $0xf] ss:$8 sm:$0xc] %vm3_vm1, %v2_v48  }
  0x19   :  { %350 = vst.msk [vmem:[%s905_s1 - $0x1e] ss:$8 sm:$0x30] %vm3_vm1, %v2_v48   ;;  %351 = vst.msk [vmem:[%s905_s1 - $0x2d] ss:$8 sm:$0xc0] %vm3_vm1, %v2_v48  }
  0x1a   :  { %353 = vst.msk [vmem:[%s905_s1 + $0x4] ss:$8 sm:$0x3] %vm3_vm1, %v352_v49   ;;  %354 = vst.msk [vmem:[%s905_s1 - $0xb] ss:$8 sm:$0xc] %vm3_vm1, %v352_v49  }
  0x1b   :  { %355 = vst.msk [vmem:[%s905_s1 - $0x1a] ss:$8 sm:$0x30] %vm3_vm1, %v352_v49   ;;  %356 = vst.msk [vmem:[%s905_s1 - $0x29] ss:$8 sm:$0xc0] %vm3_vm1, %v352_v49  }
  0x1c   :  { %235 = vrot.lane.b32.xlu1 %v234_v41, %s460_s26  ;;  %v377_v50 = vld [vmem:[%s904_s0 + $0xc0] ss:$4 sm:$0xff]   ;;  %224 = vrot.lane.b32.xlu0 %v223_v44, %s460_s26  ;;  %v433_v58 = vld [vmem:[%s904_s0 + $0x1] ss:$8 sm:$0xf]  }
  0x1d   :  { %v382_v51 = vld [vmem:[%s904_s0 + $0xe0] ss:$4 sm:$0xff]   ;;  %378 = vst.msk [vmem:[%s905_s1 + $0x30] ss:$8 sm:$0x3] %vm3_vm1, %v377_v50  }
  0x1e   :  { %v357_v52 = vld [vmem:[%s904_s0 + $0x40] ss:$4 sm:$0xff]   ;;  %379 = vst.msk [vmem:[%s905_s1 + $0x21] ss:$8 sm:$0xc] %vm3_vm1, %v377_v50  }
  0x1f   :  { %380 = vst.msk [vmem:[%s905_s1 + $0x12] ss:$8 sm:$0x30] %vm3_vm1, %v377_v50   ;;  %381 = vst.msk [vmem:[%s905_s1 + $0x3] ss:$8 sm:$0xc0] %vm3_vm1, %v377_v50  }
  0x20   :  { %383 = vst.msk [vmem:[%s905_s1 + $0x34] ss:$8 sm:$0x3] %vm3_vm1, %v382_v51   ;;  %384 = vst.msk [vmem:[%s905_s1 + $0x25] ss:$8 sm:$0xc] %vm3_vm1, %v382_v51   ;;  %257 = vrot.lane.b32.xlu1 %v256_v53, %s460_s26  ;;  %246 = vrot.lane.b32.xlu0 %v245_v55, %s460_s26 }
  0x21   :  { %385 = vst.msk [vmem:[%s905_s1 + $0x16] ss:$8 sm:$0x30] %vm3_vm1, %v382_v51   ;;  %386 = vst.msk [vmem:[%s905_s1 + $0x7] ss:$8 sm:$0xc0] %vm3_vm1, %v382_v51  }
  0x22   :  { %358 = vst.msk [vmem:[%s905_s1 + $0x10] ss:$8 sm:$0x3] %vm3_vm1, %v357_v52   ;;  %359 = vst.msk [vmem:[%s905_s1 + $0x1] ss:$8 sm:$0xc] %vm3_vm1, %v357_v52  }
  0x23   :  { %360 = vst.msk [vmem:[%s905_s1 - $0xe] ss:$8 sm:$0x30] %vm3_vm1, %v357_v52   ;;  %361 = vst.msk [vmem:[%s905_s1 - $0x1d] ss:$8 sm:$0xc0] %vm3_vm1, %v357_v52  }
  0x24   :  { %v362_v54 = vld [vmem:[%s904_s0 + $0x60] ss:$4 sm:$0xff]   ;;  %v434_v59 = vld [vmem:[%s904_s0 + $0x1] ss:$8 sm:$0xf0]   ;;  %278 = vrot.lane.b32.xlu1 %v277_v60, %s461_s25 }
  0x25   :  { %363 = vst.msk [vmem:[%s905_s1 + $0x14] ss:$8 sm:$0x3] %vm3_vm1, %v362_v54   ;;  %364 = vst.msk [vmem:[%s905_s1 + $0x5] ss:$8 sm:$0xc] %vm3_vm1, %v362_v54   ;;  %v267_v61 = vsel %vm92_vm0, %v434_v59, %v433_v58 }
  0x26   :  { %365 = vst.msk [vmem:[%s905_s1 - $0xa] ss:$8 sm:$0x30] %vm3_vm1, %v362_v54   ;;  %366 = vst.msk [vmem:[%s905_s1 - $0x19] ss:$8 sm:$0xc0] %vm3_vm1, %v362_v54   ;;  %268 = vrot.lane.b32.xlu0 %v267_v61, %s461_s25 }
  0x27   :  { %v441_v62 = vld [vmem:[%s904_s0 + $0x85] ss:$8 sm:$0xf]   ;;  %v447_v4 = vld [vmem:[%s904_s0 + $0xc1] ss:$8 sm:$0xf]  }
  0x28   :  { %v442_v63 = vld [vmem:[%s904_s0 + $0x85] ss:$8 sm:$0xf0]   ;;  %v448_v5 = vld [vmem:[%s904_s0 + $0xc1] ss:$8 sm:$0xf0]  }
  0x29   :  { %v438_v0 = vld [vmem:[%s904_s0 + $0x5] ss:$8 sm:$0xf]   ;;  %v299_v2 = vsel %vm92_vm0, %v442_v63, %v441_v62  ;;  %v444_v6 = vld [vmem:[%s904_s0 + $0x41] ss:$8 sm:$0xf]   ;;  %v321_v8 = vsel %vm92_vm0, %v448_v5, %v447_v4 }
  0x2a   :  { %v439_v1 = vld [vmem:[%s904_s0 + $0x5] ss:$8 sm:$0xf0]   ;;  %v445_v7 = vld [vmem:[%s904_s0 + $0x41] ss:$8 sm:$0xf0]   ;;  %300 = vrot.lane.b32.xlu1 %v299_v2, %s461_s25 }
  0x2b   :  { %v288_v3 = vsel %vm92_vm0, %v439_v1, %v438_v0  ;;  %v310_v9 = vsel %vm92_vm0, %v445_v7, %v444_v6  ;;  %v453_v10 = vld [vmem:[%s904_s0 + $0xc5] ss:$8 sm:$0xf]  }
  0x2c   :  { %289 = vrot.lane.b32.xlu0 %v288_v3, %s461_s25  ;;  %v454_v11 = vld [vmem:[%s904_s0 + $0xc5] ss:$8 sm:$0xf0]  }
  0x2d   :  { %v450_v12 = vld [vmem:[%s904_s0 + $0x45] ss:$8 sm:$0xf]   ;;  %v343_v14 = vsel %vm92_vm0, %v454_v11, %v453_v10 }
  0x2e   :  { %v451_v13 = vld [vmem:[%s904_s0 + $0x45] ss:$8 sm:$0xf0]   ;;  %322 = vrot.lane.b32.xlu1 %v321_v8, %s461_s25 }
  0x2f   :  { %v332_v15 = vsel %vm92_vm0, %v451_v13, %v450_v12 }
  0x30   :  { %311 = vrot.lane.b32.xlu0 %v310_v9, %s461_s25 }
  0x32   :  { %344 = vrot.lane.b32.xlu1 %v343_v14, %s461_s25 }
  0x34   :  { %333 = vrot.lane.b32.xlu0 %v332_v15, %s461_s25 }
  0x76   :  { %v116_v16 = vpop.permute.xlu1 %115   ;;  %v95_v17 = vpop.permute.xlu0 %94  }
  0x77   :  { %394 = vst.msk [vmem:[%s905_s1 + $0x8] sm:$0xff] %vm96_vm2, %v116_v16   ;;  %97 = vst.msk [vmem:[%s905_s1] sm:$0xff] %vm96_vm2, %v95_v17  }
  0x7a   :  { %v127_v18 = vpop.permute.xlu1 %126   ;;  %v105_v19 = vpop.permute.xlu0 %104  }
  0x7b   :  { %397 = vst.msk [vmem:[%s905_s1 + $0x28] sm:$0xff] %vm96_vm2, %v127_v18   ;;  %391 = vst.msk [vmem:[%s905_s1 + $0x20] sm:$0xff] %vm96_vm2, %v105_v19  }
  0x7e   :  { %v149_v20 = vpop.permute.xlu1 %148   ;;  %v138_v21 = vpop.permute.xlu0 %137  }
  0x7f   :  { %403 = vst.msk [vmem:[%s905_s1 + $0x30] sm:$0xff] %vm96_vm2, %v149_v20   ;;  %400 = vst.msk [vmem:[%s905_s1 + $0x10] sm:$0xff] %vm96_vm2, %v138_v21  }
  0x82   :  { %v171_v22 = vpop.permute.xlu1 %170   ;;  %v160_v23 = vpop.permute.xlu0 %159  }
  0x83   :  { %409 = vst.msk [vmem:[%s905_s1 + $0x38] sm:$0xff] %vm96_vm2, %v171_v22   ;;  %406 = vst.msk [vmem:[%s905_s1 + $0x18] sm:$0xff] %vm96_vm2, %v160_v23  }
  0x86   :  { %v192_v24 = vpop.permute.xlu1 %191   ;;  %v182_v25 = vpop.permute.xlu0 %181  }
  0x87   :  { %414 = vst.msk [vmem:[%s905_s1 + $0x20] sm:$0xff] %vm183_vm3, %v192_v24   ;;  %184 = vst.msk [vmem:[%s905_s1] sm:$0xff] %vm183_vm3, %v182_v25  }
  0x8a   :  { %v214_v26 = vpop.permute.xlu1 %213   ;;  %v203_v27 = vpop.permute.xlu0 %202  }
  0x8b   :  { %420 = vst.msk [vmem:[%s905_s1 + $0x28] sm:$0xff] %vm183_vm3, %v214_v26   ;;  %417 = vst.msk [vmem:[%s905_s1 + $0x8] sm:$0xff] %vm183_vm3, %v203_v27  }
  0x8e   :  { %v236_v28 = vpop.permute.xlu1 %235   ;;  %v225_v29 = vpop.permute.xlu0 %224  }
  0x8f   :  { %426 = vst.msk [vmem:[%s905_s1 + $0x30] sm:$0xff] %vm183_vm3, %v236_v28   ;;  %423 = vst.msk [vmem:[%s905_s1 + $0x10] sm:$0xff] %vm183_vm3, %v225_v29  }
  0x92   :  { %v258_v30 = vpop.permute.xlu1 %257   ;;  %v247_v31 = vpop.permute.xlu0 %246  }
  0x93   :  { %432 = vst.msk [vmem:[%s905_s1 + $0x38] sm:$0xff] %vm183_vm3, %v258_v30   ;;  %429 = vst.msk [vmem:[%s905_s1 + $0x18] sm:$0xff] %vm183_vm3, %v247_v31  }
  0x96   :  { %v279_v32 = vpop.permute.xlu1 %278  }
  0x97   :  { %437 = vst.msk [vmem:[%s905_s1 + $0x20] sm:$0xff] %vm270_vm4, %v279_v32  }
  0x98   :  { %v269_v33 = vpop.permute.xlu0 %268  }
  0x99   :  { %271 = vst.msk [vmem:[%s905_s1] sm:$0xff] %vm270_vm4, %v269_v33  }
  0x9c   :  { %v301_v34 = vpop.permute.xlu1 %300  }
  0x9d   :  { %443 = vst.msk [vmem:[%s905_s1 + $0x28] sm:$0xff] %vm270_vm4, %v301_v34  }
  0x9e   :  { %v290_v35 = vpop.permute.xlu0 %289  }
  0x9f   :  { %440 = vst.msk [vmem:[%s905_s1 + $0x8] sm:$0xff] %vm270_vm4, %v290_v35  }
  0xa0   :  { %v323_v36 = vpop.permute.xlu1 %322  }
  0xa1   :  { %449 = vst.msk [vmem:[%s905_s1 + $0x30] sm:$0xff] %vm270_vm4, %v323_v36  }
  0xa2   :  { %v312_v37 = vpop.permute.xlu0 %311  }
  0xa3   :  { %446 = vst.msk [vmem:[%s905_s1 + $0x10] sm:$0xff] %vm270_vm4, %v312_v37  }
  0xa4   :  { %v345_v38 = vpop.permute.xlu1 %344  }
  0xa5   :  { %455 = vst.msk [vmem:[%s905_s1 + $0x38] sm:$0xff] %vm270_vm4, %v345_v38  }
  0xa6   :  { %v334_v39 = vpop.permute.xlu0 %333  }
  0xa7   :  { %452 = vst.msk [vmem:[%s905_s1 + $0x18] sm:$0xff] %vm270_vm4, %v334_v39  }

// kernel: embedding_forward.1
= control target key start
LH: loop header
LB: loop body
LE: loop exit
PB: predicated region body
PF: predicated region fallthrough
CT: control target
= control target key end

     0   :  { %v570_v62 = vmov 0.0   ;;  %vm142_vm0 = vcmask 261120   ;;  %vm326_vm1 = vcmask 64512   ;;  %s829_s1 = inlined_call_operand.vmem [shape: f32[256,32], index: 1, kind: input, shape index: {}]   ;;  %s830_s0 = inlined_call_operand.vmem [shape: f32[2,256], index: 0, kind: input, shape index: {}]   ;;  %s831_s2 = inlined_call_operand.vmem [shape: f32[32,256], index: 2, kind: input, shape index: {}]   ;;  %s832_s3 = inlined_call_operand.vmem [shape: f32[256,8], index: 3, kind: input, shape index: {}]   ;;  %s833_s4 = inlined_call_operand.vmem [shape: f32[8,256], index: 4, kind: input, shape index: {}]   ;;  %s834_s5 = inlined_call_operand.vmem [shape: f32[2,256], index: 5, kind: output, shape index: {}]  }
   0x1   :  { %v37_v0 = vld [vmem:[%s829_s1 + $0x80] sm:$0xff]  ;;  %v38_v1 = vld [vmem:[%s829_s1 + $0x88] sm:$0xff]  ;;  %v39_v5 = vld [vmem:[%s829_s1 + $0x90] sm:$0xff]  ;;  %210 = vmatprep.mubr.f32.mxu1 %v570_v62 }
   0x2   :  { %v21_v2 = vld [vmem:[%s829_s1] sm:$0xff]  ;;  %v491_v3 = vpack.c.bf16 %v38_v1, %v37_v0  ;;  %v22_v4 = vld [vmem:[%s829_s1 + $0x8] sm:$0xff]  ;;  %v40_v6 = vld [vmem:[%s829_s1 + $0x98] sm:$0xff] }
   0x3   :  { %v493_v7 = vpack.c.bf16 %v22_v4, %v21_v2  ;;  %v495_v8 = vpack.c.bf16 %v40_v6, %v39_v5  ;;  %v23_v9 = vld [vmem:[%s829_s1 + $0x10] sm:$0xff]  ;;  %v24_v10 = vld [vmem:[%s829_s1 + $0x18] sm:$0xff]  ;;  %v41_v11 = vld [vmem:[%s829_s1 + $0xa0] sm:$0xff] }
   0x4   :  { %492 = vmatprep.subr.bf16.mxu0 %v491_v3  ;;  %v42_v12 = vld [vmem:[%s829_s1 + $0xa8] sm:$0xff]  ;;  %v497_v13 = vpack.c.bf16 %v24_v10, %v23_v9  ;;  %v25_v15 = vld [vmem:[%s829_s1 + $0x20] sm:$0xff]  ;;  %v43_v17 = vld [vmem:[%s829_s1 + $0xb0] sm:$0xff] }
   0x5   :  { %494 = vmatpush3.bf16.msra.mxu0 %v493_v7  ;;  %v499_v14 = vpack.c.bf16 %v42_v12, %v41_v11  ;;  %v26_v16 = vld [vmem:[%s829_s1 + $0x28] sm:$0xff]  ;;  %v44_v18 = vld [vmem:[%s829_s1 + $0xb8] sm:$0xff]  ;;  %v27_v21 = vld [vmem:[%s829_s1 + $0x30] sm:$0xff] }
   0x6   :  { %496 = vmatprep.subr.bf16.mxu0 %v495_v8  ;;  %v501_v19 = vpack.c.bf16 %v26_v16, %v25_v15  ;;  %v503_v20 = vpack.c.bf16 %v44_v18, %v43_v17  ;;  %v28_v22 = vld [vmem:[%s829_s1 + $0x38] sm:$0xff]  ;;  %v45_v23 = vld [vmem:[%s829_s1 + $0xc0] sm:$0xff]  ;;  %v46_v24 = vld [vmem:[%s829_s1 + $0xc8] sm:$0xff] }
   0x7   :  { %v417_v25 = vld.sshfl [vmem:[%s830_s0] sm:$0x33 pattern:$0x76325410]  ;;  %v135_v27 = vld [vmem:[%s831_s2 + $0x8] sm:$0xff]  ;;  %v137_v28 = vld [vmem:[%s831_s2 + $0x18] sm:$0xff]  ;;  %v505_v30 = vpack.c.bf16 %v28_v22, %v27_v21  ;;  %v507_v33 = vpack.c.bf16 %v46_v24, %v45_v23 }
   0x8   :  { %v61_v26 = vcombine.high %v417_v25, %v417_v25  ;;  %v134_v29 = vld [vmem:[%s831_s2] sm:$0xff]  ;;  %v523_v31 = vpack.c.bf16 %v137_v28, %v135_v27  ;;  %v136_v32 = vld [vmem:[%s831_s2 + $0x10] sm:$0xff]  ;;  %v30_v35 = vld [vmem:[%s829_s1 + $0x48] sm:$0xff] }
   0x9   :  { %498 = vmatpush3.bf16.msra.mxu0 %v497_v13  ;;  %v29_v34 = vld [vmem:[%s829_s1 + $0x40] sm:$0xff]  ;;  %v525_v36 = vpack.c.bf16 %v136_v32, %v134_v29  ;;  %v47_v37 = vld [vmem:[%s829_s1 + $0xd0] sm:$0xff]  ;;  %v48_v38 = vld [vmem:[%s829_s1 + $0xd8] sm:$0xff] }
   0xa   :  { %500 = vmatprep.subr.bf16.mxu0 %v499_v14  ;;  %128 = vmatprep.mubr.f32.mxu0 %v61_v26  ;;  %v509_v39 = vpack.c.bf16 %v30_v35, %v29_v34  ;;  %v511_v40 = vpack.c.bf16 %v48_v38, %v47_v37  ;;  %v31_v41 = vld [vmem:[%s829_s1 + $0x50] sm:$0xff]  ;;  %v32_v42 = vld [vmem:[%s829_s1 + $0x58] sm:$0xff]  ;;  %v49_v43 = vld [vmem:[%s829_s1 + $0xe0] sm:$0xff] }
   0xb   :  { %524 = vmatprep.subr.bf16.mxu1 %v523_v31  ;;  %v50_v44 = vld [vmem:[%s829_s1 + $0xe8] sm:$0xff]  ;;  %v513_v45 = vpack.c.bf16 %v32_v42, %v31_v41  ;;  %v33_v47 = vld [vmem:[%s829_s1 + $0x60] sm:$0xff]  ;;  %v51_v49 = vld [vmem:[%s829_s1 + $0xf0] sm:$0xff] }
   0xc   :  { %526 = vmatpush1.bf16.msra.mxu1 %v525_v36  ;;  %v515_v46 = vpack.c.bf16 %v50_v44, %v49_v43  ;;  %v34_v48 = vld [vmem:[%s829_s1 + $0x68] sm:$0xff]  ;;  %v52_v50 = vld [vmem:[%s829_s1 + $0xf8] sm:$0xff]  ;;  %v35_v53 = vld [vmem:[%s829_s1 + $0x70] sm:$0xff] }
   0xd   :  { %502 = vmatpush3.bf16.msra.mxu0 %v501_v19  ;;  %v517_v51 = vpack.c.bf16 %v34_v48, %v33_v47  ;;  %v519_v52 = vpack.c.bf16 %v52_v50, %v51_v49  ;;  %v36_v54 = vld [vmem:[%s829_s1 + $0x78] sm:$0xff]  ;;  %v139_v56 = vld [vmem:[%s831_s2 + $0x28] sm:$0xff]  ;;  %v138_v59 = vld [vmem:[%s831_s2 + $0x20] sm:$0xff] }
   0xe   :  { %504 = vmatprep.subr.bf16.mxu0 %v503_v20  ;;  %v521_v55 = vpack.c.bf16 %v36_v54, %v35_v53  ;;  %v141_v57 = vld [vmem:[%s831_s2 + $0x38] sm:$0xff]  ;;  %v140_v60 = vld [vmem:[%s831_s2 + $0x30] sm:$0xff]  ;;  %v233_v63 = vld [vmem:[%s832_s3 + $0x80] sm:$0xff] }
   0xf   :  { %v527_v58 = vpack.c.bf16 %v141_v57, %v139_v56  ;;  %v529_v61 = vpack.c.bf16 %v140_v60, %v138_v59  ;;  %v234_v0 = vld [vmem:[%s832_s3 + $0x88] sm:$0xff]  ;;  %v217_v2 = vld [vmem:[%s832_s3] sm:$0xff]  ;;  %v235_v4 = vld [vmem:[%s832_s3 + $0x90] sm:$0xff] }
  0x10   :  { %v531_v1 = vpack.c.bf16 %v234_v0, %v233_v63  ;;  %v218_v3 = vld [vmem:[%s832_s3 + $0x8] sm:$0xff]  ;;  %v236_v5 = vld [vmem:[%s832_s3 + $0x98] sm:$0xff]  ;;  %v219_v11 = vld [vmem:[%s832_s3 + $0x10] sm:$0xff] }
  0x11   :  { %506 = vmatpush3.bf16.msra.mxu0 %v505_v30  ;;  %528 = vmatprep.subr.bf16.mxu1 %v527_v58  ;;  %v533_v8 = vpack.c.bf16 %v218_v3, %v217_v2  ;;  %v535_v10 = vpack.c.bf16 %v236_v5, %v235_v4  ;;  %v220_v12 = vld [vmem:[%s832_s3 + $0x18] sm:$0xff]  ;;  %v237_v13 = vld [vmem:[%s832_s3 + $0xa0] sm:$0xff]  ;;  %v238_v14 = vld [vmem:[%s832_s3 + $0xa8] sm:$0xff] }
  0x12   :  { %508 = vmatprep.subr.bf16.mxu0 %v507_v33  ;;  %530 = vmatpush1.bf16.msra.mxu1 %v529_v61  ;;  %v537_v15 = vpack.c.bf16 %v220_v12, %v219_v11  ;;  %v539_v16 = vpack.c.bf16 %v238_v14, %v237_v13  ;;  %v221_v17 = vld [vmem:[%s832_s3 + $0x20] sm:$0xff]  ;;  %v222_v18 = vld [vmem:[%s832_s3 + $0x28] sm:$0xff]  ;;  %v239_v19 = vld [vmem:[%s832_s3 + $0xb0] sm:$0xff] }
  0x13   :  { %532 = vmatprep.subr.bf16.mxu1 %v531_v1  ;;  %v240_v20 = vld [vmem:[%s832_s3 + $0xb8] sm:$0xff]  ;;  %v541_v21 = vpack.c.bf16 %v222_v18, %v221_v17  ;;  %v223_v23 = vld [vmem:[%s832_s3 + $0x30] sm:$0xff]  ;;  %v241_v26 = vld [vmem:[%s832_s3 + $0xc0] sm:$0xff] }
  0x14   :  { %v543_v22 = vpack.c.bf16 %v240_v20, %v239_v19  ;;  %v224_v24 = vld [vmem:[%s832_s3 + $0x38] sm:$0xff]  ;;  %v242_v27 = vld [vmem:[%s832_s3 + $0xc8] sm:$0xff]  ;;  %v225_v29 = vld [vmem:[%s832_s3 + $0x40] sm:$0xff] }
  0x15   :  { %510 = vmatpush3.bf16.msra.mxu0 %v509_v39  ;;  %v547_v28 = vpack.c.bf16 %v242_v27, %v241_v26  ;;  %v226_v30 = vld [vmem:[%s832_s3 + $0x48] sm:$0xff]  ;;  %v243_v32 = vld [vmem:[%s832_s3 + $0xd0] sm:$0xff]  ;;  %v244_v33 = vld [vmem:[%s832_s3 + $0xd8] sm:$0xff] }
  0x16   :  { %512 = vmatprep.subr.bf16.mxu0 %v511_v40  ;;  %v549_v31 = vpack.c.bf16 %v226_v30, %v225_v29  ;;  %v551_v34 = vpack.c.bf16 %v244_v33, %v243_v32  ;;  %v227_v35 = vld [vmem:[%s832_s3 + $0x50] sm:$0xff]  ;;  %v228_v36 = vld [vmem:[%s832_s3 + $0x58] sm:$0xff]  ;;  %v245_v38 = vld [vmem:[%s832_s3 + $0xe0] sm:$0xff] }
  0x17   :  { %v553_v37 = vpack.c.bf16 %v228_v36, %v227_v35  ;;  %v246_v39 = vld [vmem:[%s832_s3 + $0xe8] sm:$0xff]  ;;  %v229_v40 = vld [vmem:[%s832_s3 + $0x60] sm:$0xff]  ;;  %v247_v43 = vld [vmem:[%s832_s3 + $0xf0] sm:$0xff] }
  0x18   :  { %v555_v41 = vpack.c.bf16 %v246_v39, %v245_v38  ;;  %v230_v42 = vld [vmem:[%s832_s3 + $0x68] sm:$0xff]  ;;  %v248_v44 = vld [vmem:[%s832_s3 + $0xf8] sm:$0xff]  ;;  %v231_v47 = vld [vmem:[%s832_s3 + $0x70] sm:$0xff] }
  0x19   :  { %514 = vmatpush3.bf16.msra.mxu0 %v513_v45  ;;  %v557_v45 = vpack.c.bf16 %v230_v42, %v229_v40  ;;  %v232_v48 = vld [vmem:[%s832_s3 + $0x78] sm:$0xff]  ;;  %v325_v56 = vld [vmem:[%s833_s4 + $0x8] sm:$0xff]  ;;  %v324_v57 = vld [vmem:[%s833_s4] sm:$0xff] }
  0x1a   :  { %516 = vmatprep.subr.bf16.mxu0 %v515_v46  ;;  %v559_v46 = vpack.c.bf16 %v248_v44, %v247_v43  ;;  %v561_v49 = vpack.c.bf16 %v232_v48, %v231_v47 }
  0x1d   :  { %518 = vmatpush3.bf16.msra.mxu0 %v517_v51 }
  0x1e   :  { %520 = vmatprep.subr.bf16.mxu0 %v519_v52 }
  0x21   :  { %522 = vmatpush3.bf16.msra.mxu0 %v521_v55 }
  0x22   :  { %330 = vmatprep.subr.mxu0 %v325_v56 }
  0x24   :  { %129 = vmatmul.mubr.f32.vlgmr.msra.gmra.mrb[0].mxu0 %v417_v25  ;;  %v545_v25 = vpack.c.bf16 %v224_v24, %v223_v23 }
  0x25   :  { %394 = vmatprep.mubr.f32.mxu0 %v570_v62  ;;  %331 = vmatpush1.msra.mxu0 %v324_v57 }
  0xf7   :  { %v453_v6 = vpop.f32.mrb[0].mxu0 }
  0xf8   :  { %v454_v7 = vpop.f32.mrb[1].mxu0 }
  0xf9   :  { %v455_v9 = vadd.f32 %v454_v7, %v453_v6 }
  0xfb   :  { %418 = vmatmul.mubr.msk.f32.vlgmr.msra.gmra.mrb[0].mxu1 %vm142_vm0, %v455_v9 }
  0xfc   :  { %534 = vmatpush3.bf16.msra.mxu1 %v533_v8 }
  0xfd   :  { %536 = vmatprep.subr.bf16.mxu1 %v535_v10 }
 0x100   :  { %538 = vmatpush3.bf16.msra.mxu1 %v537_v15 }
 0x101   :  { %540 = vmatprep.subr.bf16.mxu1 %v539_v16 }
 0x104   :  { %542 = vmatpush3.bf16.msra.mxu1 %v541_v21 }
 0x105   :  { %544 = vmatprep.subr.bf16.mxu1 %v543_v22 }
 0x108   :  { %546 = vmatpush3.bf16.msra.mxu1 %v545_v25 }
 0x109   :  { %548 = vmatprep.subr.bf16.mxu1 %v547_v28 }
 0x10c   :  { %550 = vmatpush3.bf16.msra.mxu1 %v549_v31 }
 0x10d   :  { %552 = vmatprep.subr.bf16.mxu1 %v551_v34 }
 0x110   :  { %554 = vmatpush3.bf16.msra.mxu1 %v553_v37 }
 0x111   :  { %556 = vmatprep.subr.bf16.mxu1 %v555_v41 }
 0x114   :  { %558 = vmatpush3.bf16.msra.mxu1 %v557_v45 }
 0x115   :  { %560 = vmatprep.subr.bf16.mxu1 %v559_v46 }
 0x118   :  { %562 = vmatpush3.bf16.msra.mxu1 %v561_v49 }
 0x1ce   :  { %v212_v50 = vpop.f32.mrb[0].mxu1 }
 0x1cf   :  { %v249_v51 = vmul.f32 1.442695, %v212_v50  ;;  %v214_v52 = vpop.f32.mrb[1].mxu1 }
 0x1d0   :  { %v251_v53 = vmul.f32 1.442695, %v214_v52 }
 0x1d2   :  { %564 = vpow2.f32 %v251_v53 }
 0x1d3   :  { %566 = vpow2.f32 %v249_v51 }
 0x1dc   :  { %v565_v54 = vpop.eup %564 }
 0x1dd   :  { %v567_v55 = vpop.eup %566  ;;  %317 = vmatprep.mubr.f32.mxu1 %v565_v54 }
 0x1de   :  { %318 = vmatmul.mubr.f32.vlgmr.msra.gmra.mrb[2].mxu1 %v567_v55 }
 0x2b1   :  { %v488_v58 = vpop.f32.mrb[2].mxu1 }
 0x2b2   :  { %v489_v59 = vpop.f32.mrb[3].mxu1 }
 0x2b3   :  { %v490_v60 = vadd.f32 %v489_v59, %v488_v58 }
 0x2b5   :  { %568 = vrcp.f32 %v490_v60 }
 0x2bf   :  { %v569_v61 = vpop.eup %568 }
 0x2c0   :  { %419 = vmatmul.mubr.msk.f32.vlgmr.msra.gmra.mrb[2].mxu0 %vm326_vm1, %v569_v61 }
 0x393   :  { %v396_v62 = vpop.f32.mrb[2].mxu0 }
 0x394   :  { %v398_v63 = vpop.f32.mrb[3].mxu0 }
 0x395   :  { %v403_v0 = vcombine.low %v396_v62, %v398_v63 }
 0x397   :  { %420 = vst.sshfl [vmem:[%s834_s5] sm:$0x33 pattern:$0x76325410] %v403_v0 }

</bundles_post_ra>
